<compile_context>
chip_gen: v5e
topology: v5e:2x2
jax: 0.10.0
libtpu: 0.0.40
codegen_flags: <defaults>
</compile_context>

<pallas_src>
import functools

import numpy as np
import jax
import jax.numpy as jnp
from jax import lax
from jax.experimental import pallas as pl
from jax.experimental.pallas import tpu as pltpu


def _make_kernel(D, H, W, Cin, Cout, KD, KH, dd, dh, pd, ph, pw,
                 D1, H1, Wo, Dp, Hp, WpC):
    """Per (sample, group) kernel: h = relu(x*scale + bias); y = dilated_conv3d(h, w).

    Layouts (lane dim last):
      x_ref     : (1, 1, D, H, W*Cin)          f32
      scale/bias: (1, 1, W*Cin)                f32  (per-channel BN affine, tiled over W)
      w_ref     : (1, KD*KH, Wp*Cin, Wo*Cout)  bf16 (W-tap conv + Cout as a block matrix)
      o_ref     : (1, 1, D1, H1, Wo*Cout)      f32  (lane-dense output)
      hpad_ref  : (Dp, Hp, Wp*Cin)             f32  (zero-padded activation scratch)
    """

    def kernel(x_ref, scale_ref, bias_ref, w_ref, o_ref, hpad_ref):
        # --- zero only the padding frame; the interior is fully overwritten below.
        #     (Re-done every grid step so it is correct for any core/grid order.)
        if pd > 0:
            hpad_ref[0:pd, :, :] = jnp.zeros((pd, Hp, WpC), jnp.float32)
            hpad_ref[pd + D:Dp, :, :] = jnp.zeros((Dp - pd - D, Hp, WpC), jnp.float32)
        if ph > 0:
            hpad_ref[pd:pd + D, 0:ph, :] = jnp.zeros((D, ph, WpC), jnp.float32)
            hpad_ref[pd:pd + D, ph + H:Hp, :] = jnp.zeros((D, Hp - ph - H, WpC),
                                                          jnp.float32)
        if pw > 0:
            hpad_ref[pd:pd + D, ph:ph + H, 0:pw * Cin] = jnp.zeros((D, H, pw * Cin),
                                                                   jnp.float32)
            hpad_ref[pd:pd + D, ph:ph + H, (pw + W) * Cin:WpC] = jnp.zeros(
                (D, H, WpC - (pw + W) * Cin), jnp.float32)

        # --- BatchNorm (pre-folded scale/bias) + ReLU, f32 on the VPU.
        x = x_ref[0, 0]                              # (D, H, W*Cin)
        h = jnp.maximum(x * scale_ref[0] + bias_ref[0], 0.0)
        hpad_ref[pd:pd + D, ph:ph + H, pw * Cin:(pw + W) * Cin] = h

        # --- dilated conv: KD*KH fused block matmuls, bf16 operands, f32 accumulate.
        #     Each tap contracts over (padded W x Cin) and produces the full
        #     lane-dense (W_out*Cout) output row block.
        acc = jnp.zeros((D1 * H1, Wo * Cout), jnp.float32)
        for kd in range(KD):
            for kh in range(KH):
                t = kd * KH + kh
                slab = hpad_ref[kd * dd:kd * dd + D1, kh * dh:kh * dh + H1, :]
                slab = slab.reshape(D1 * H1, WpC).astype(jnp.bfloat16)
                acc = acc + jnp.dot(slab, w_ref[0, t],
                                    preferred_element_type=jnp.float32)

        o_ref[...] = acc.reshape(1, 1, D1, H1, Wo * Cout)

    return kernel


def _bn_scale_bias(x_ncdhw, gamma, beta, eps):
    """Training-mode BatchNorm3d folded into per-channel scale/bias (single pass)."""
    x = x_ncdhw.astype(jnp.float32)
    mean = jnp.mean(x, axis=(0, 2, 3, 4))
    mean_sq = jnp.mean(x * x, axis=(0, 2, 3, 4))
    var = jnp.maximum(mean_sq - mean * mean, 0.0)        # biased variance
    scale = gamma.astype(jnp.float32) / jnp.sqrt(var + eps)
    bias = beta.astype(jnp.float32) - mean * scale
    return scale, bias


def dilated_conv3d_block(x_ncdhw, gamma, beta, weight, *,
                         kernel_size, stride, dilation, groups=1, eps=1e-5):
    """Forward pass of DilatedConv3DBlock.

    x_ncdhw : (N, Cin, D, H, W)                    float32
    gamma, beta : (Cin,)                           BatchNorm3d affine params
    weight : (Cout, Cin//groups, KD, KH, KW)       conv weight (no bias)
    Returns (N, Cout, Dout, Hout, Wout).
    """
    N, Cin, D, H, W = x_ncdhw.shape
    KD, KH, KW = kernel_size
    dd, dh, dw = dilation
    if isinstance(stride, int):
        sd = sh = sw = stride
    else:
        sd, sh, sw = stride
    pd, ph, pw = [((k - 1) // 2) * di for k, di in zip(kernel_size, dilation)]
    Cout = weight.shape[0]
    G = groups
    Cin_g = Cin // G
    Cout_g = Cout // G

    # stride-1 output extents along D/H (strides there applied by subsampling);
    # the W stride is folded directly into the block weights.
    D1 = D + 2 * pd - dd * (KD - 1)
    H1 = H + 2 * ph - dh * (KH - 1)
    Wo = (W + 2 * pw - dw * (KW - 1) - 1) // sw + 1
    Dp, Hp, Wp = D + 2 * pd, H + 2 * ph, W + 2 * pw
    WCin = W * Cin_g
    WpC = Wp * Cin_g
    WoCout = Wo * Cout_g
    KT2 = KD * KH

    # BN scale/bias, tiled over W so they broadcast against the (W*Cin) lane fold.
    scale_c, bias_c = _bn_scale_bias(x_ncdhw, gamma, beta, eps)
    scale_g = jnp.broadcast_to(scale_c.reshape(G, 1, Cin_g),
                               (G, W, Cin_g)).reshape(G, 1, WCin)
    bias_g = jnp.broadcast_to(bias_c.reshape(G, 1, Cin_g),
                              (G, W, Cin_g)).reshape(G, 1, WCin)

    # Input: NCDHW -> (N, G, D, H, W*Cin_g), channels-last with W folded into lanes.
    x = jnp.transpose(x_ncdhw.astype(jnp.float32), (0, 2, 3, 4, 1))       # NDHWC
    x = x.reshape(N, D, H, W, G, Cin_g).transpose(0, 4, 1, 2, 3, 5)
    x = x.reshape(N, G, D, H, WCin)

    # Block weights: (G, KD*KH, Wp*Cin_g, Wo*Cout_g).  The W-tap convolution
    # (including the W stride) and Cout are expressed as a sparse block matrix so
    # the matmul output is already in the lane-dense (W_out, Cout) fold.
    sel = np.zeros((KW, Wp, Wo), np.float32)
    for kw in range(KW):
        for wo in range(Wo):
            sel[kw, wo * sw + kw * dw, wo] = 1.0
    w6 = weight.astype(jnp.float32).reshape(G, Cout_g, Cin_g, KD, KH, KW)
    bigw = jnp.einsum('kpq,goidhk->gdhpiqo', jnp.asarray(sel), w6)
    bigw = bigw.reshape(G, KT2, WpC, WoCout).astype(jnp.bfloat16)

    kern = _make_kernel(D, H, W, Cin_g, Cout_g, KD, KH, dd, dh, pd, ph, pw,
                        D1, H1, Wo, Dp, Hp, WpC)

    out = pl.pallas_call(
        kern,
        out_shape=jax.ShapeDtypeStruct((N, G, D1, H1, WoCout), jnp.float32),
        grid_spec=pltpu.PrefetchScalarGridSpec(
            num_scalar_prefetch=0,
            grid=(N, G),
            in_specs=[
                pl.BlockSpec((1, 1, D, H, WCin), lambda n, g: (n, g, 0, 0, 0)),
                pl.BlockSpec((1, 1, WCin), lambda n, g: (g, 0, 0)),
                pl.BlockSpec((1, 1, WCin), lambda n, g: (g, 0, 0)),
                # Constant per-group block index -> the pipeline skips re-fetching
                # the weight block when the index does not change between steps.
                pl.BlockSpec((1, KT2, WpC, WoCout), lambda n, g: (g, 0, 0, 0)),
            ],
            out_specs=pl.BlockSpec((1, 1, D1, H1, WoCout),
                                   lambda n, g: (n, g, 0, 0, 0)),
            scratch_shapes=[pltpu.VMEM((Dp, Hp, WpC), jnp.float32)],
        ),
        compiler_params=pltpu.CompilerParams(
            dimension_semantics=("parallel", "parallel")),
    )(x, scale_g, bias_g, bigw)

    # Apply D/H stride by subsampling (same positions as a strided conv);
    # W stride was already folded into the block weights.
    if sd > 1 or sh > 1:
        out = out[:, :, ::sd, ::sh, :]
    Do, Ho = out.shape[2], out.shape[3]

    # (N, G, Do, Ho, Wo*Cout_g) -> (N, Cout, Do, Ho, Wo), group-major channels.
    out = out.reshape(N, G, Do, Ho, Wo, Cout_g)
    out = jnp.transpose(out, (0, 1, 5, 2, 3, 4)).reshape(N, Cout, Do, Ho, Wo)
    return out


def _reference(x_ncdhw, gamma, beta, weight, *, kernel_size, stride,
               dilation, groups=1, eps=1e-5):
    """Pure-JAX reference: BN(train) -> ReLU -> dilated conv3d.

    Matches the kernel's numerics: f32 BN/ReLU, bf16 conv operands, f32 accumulate.
    """
    KD, KH, KW = kernel_size
    dd, dh, dw = dilation
    if isinstance(stride, int):
        stride = (stride,) * 3
    pd, ph, pw = [((k - 1) // 2) * di for k, di in zip(kernel_size, dilation)]
    scale, bias = _bn_scale_bias(x_ncdhw, gamma, beta, eps)
    x = jnp.transpose(x_ncdhw.astype(jnp.float32), (0, 2, 3, 4, 1))       # NDHWC
    h = jnp.maximum(x * scale + bias, 0.0).astype(jnp.bfloat16)
    w_dhwio = jnp.transpose(weight.astype(jnp.float32),
                            (2, 3, 4, 1, 0)).astype(jnp.bfloat16)
    y = lax.conv_general_dilated(
        h, w_dhwio,
        window_strides=stride,
        padding=[(pd, pd), (ph, ph), (pw, pw)],
        rhs_dilation=(dd, dh, dw),
        dimension_numbers=("NDHWC", "DHWIO", "NDHWC"),
        feature_group_count=groups,
        preferred_element_type=jnp.float32)
    return jnp.transpose(y, (0, 4, 1, 2, 3))


if __name__ == "__main__":
    # Module config: num_in=8, num_out=16, kernel_size=(3,3,3), dilation=(2,2,2),
    # stride=1, groups=1, norm='bn'.
    N, Cin, D, H, W = 2, 8, 8, 8, 8
    Cout = 16
    kernel_size = (3, 3, 3)
    dilation = (2, 2, 2)
    stride = 1
    groups = 1

    key = jax.random.PRNGKey(0)
    kx, kw, kg, kb = jax.random.split(key, 4)
    x = jax.random.normal(kx, (N, Cin, D, H, W), jnp.float32)
    weight = 0.1 * jax.random.normal(
        kw, (Cout, Cin // groups) + kernel_size, jnp.float32)
    gamma = 1.0 + 0.1 * jax.random.normal(kg, (Cin,), jnp.float32)
    beta = 0.1 * jax.random.normal(kb, (Cin,), jnp.float32)

    fwd = functools.partial(dilated_conv3d_block,
                            kernel_size=kernel_size, stride=stride,
                            dilation=dilation, groups=groups)
    out = jax.jit(fwd)(x, gamma, beta, weight)
    out = jax.block_until_ready(out)

    ref = _reference(x, gamma, beta, weight, kernel_size=kernel_size,
                     stride=stride, dilation=dilation, groups=groups)
    ref = jax.block_until_ready(ref)

    assert out.shape == ref.shape, (out.shape, ref.shape)
    max_err = float(jnp.max(jnp.abs(out - ref)))
    # Both paths use bf16 matmul operands with f32 accumulation; residual diff is
    # accumulation order only.
    assert max_err < 2e-3, f"max abs error {max_err}"

    print("KERNEL_OK")
</pallas_src>

<mosaic_0001>
module attributes {stable_mosaic.version = 11 : i64} {
  func.func @kernel(%arg0: i32, %arg1: i32, %arg2: memref<1x1x8x8x64xf32, #tpu.memory_space<vmem>>, %arg3: memref<1x1x64xf32, #tpu.memory_space<vmem>>, %arg4: memref<1x1x64xf32, #tpu.memory_space<vmem>>, %arg5: memref<1x9x96x128xbf16, #tpu.memory_space<vmem>>, %arg6: memref<1x1x8x8x128xf32, #tpu.memory_space<vmem>>, %arg7: memref<12x12x96xf32, #tpu.memory_space<vmem>>) attributes {dimension_semantics = [#tpu.dimension_semantics<parallel>, #tpu.dimension_semantics<parallel>], iteration_bounds = array<i64: 2, 1>, scalar_prefetch = 0 : i64, scratch_operands = 1 : i64, tpu.core_type = #tpu.core_type<tc>, window_params = [{transform_indices = @transform_0, window_bounds = array<i64: 1, 1, 8, 8, 64>}, {transform_indices = @transform_1, window_bounds = array<i64: 1, 1, 64>}, {transform_indices = @transform_2, window_bounds = array<i64: 1, 1, 64>}, {transform_indices = @transform_3, window_bounds = array<i64: 1, 9, 96, 128>}, {transform_indices = @transform_4, window_bounds = array<i64: 1, 1, 8, 8, 128>}]} {
    %cst = arith.constant 0.000000e+00 : f32
    %0 = vector.broadcast %cst : f32 to vector<2x12x96xf32>
    %c0 = arith.constant 0 : index
    %c0_0 = arith.constant 0 : index
    %c0_1 = arith.constant 0 : index
    %1 = vector.load %arg7[%c0, %c0_0, %c0_1] : memref<12x12x96xf32, #tpu.memory_space<vmem>>, vector<2x12x96xf32>
    tpu.vector_store %arg7[%c0, %c0_0, %c0_1], %0 {strides = array<i32>} : memref<12x12x96xf32, #tpu.memory_space<vmem>>, vector<2x12x96xf32>,
    %cst_2 = arith.constant 0.000000e+00 : f32
    %2 = vector.broadcast %cst_2 : f32 to vector<2x12x96xf32>
    %c10 = arith.constant 10 : index
    %c0_3 = arith.constant 0 : index
    %c0_4 = arith.constant 0 : index
    %3 = vector.load %arg7[%c10, %c0_3, %c0_4] : memref<12x12x96xf32, #tpu.memory_space<vmem>>, vector<2x12x96xf32>
    tpu.vector_store %arg7[%c10, %c0_3, %c0_4], %2 {strides = array<i32>} : memref<12x12x96xf32, #tpu.memory_space<vmem>>, vector<2x12x96xf32>,
    %cst_5 = arith.constant 0.000000e+00 : f32
    %4 = vector.broadcast %cst_5 : f32 to vector<8x2x96xf32>
    %c2 = arith.constant 2 : index
    %c0_6 = arith.constant 0 : index
    %c0_7 = arith.constant 0 : index
    %5 = vector.load %arg7[%c2, %c0_6, %c0_7] : memref<12x12x96xf32, #tpu.memory_space<vmem>>, vector<8x2x96xf32>
    tpu.vector_store %arg7[%c2, %c0_6, %c0_7], %4 {strides = array<i32>} : memref<12x12x96xf32, #tpu.memory_space<vmem>>, vector<8x2x96xf32>,
    %cst_8 = arith.constant 0.000000e+00 : f32
    %6 = vector.broadcast %cst_8 : f32 to vector<8x2x96xf32>
    %c2_9 = arith.constant 2 : index
    %c10_10 = arith.constant 10 : index
    %c0_11 = arith.constant 0 : index
    %7 = vector.load %arg7[%c2_9, %c10_10, %c0_11] : memref<12x12x96xf32, #tpu.memory_space<vmem>>, vector<8x2x96xf32>
    tpu.vector_store %arg7[%c2_9, %c10_10, %c0_11], %6 {strides = array<i32>} : memref<12x12x96xf32, #tpu.memory_space<vmem>>, vector<8x2x96xf32>,
    %cst_12 = arith.constant 0.000000e+00 : f32
    %8 = vector.broadcast %cst_12 : f32 to vector<8x8x16xf32>
    %c2_13 = arith.constant 2 : index
    %c2_14 = arith.constant 2 : index
    %c0_15 = arith.constant 0 : index
    %9 = vector.load %arg7[%c2_13, %c2_14, %c0_15] : memref<12x12x96xf32, #tpu.memory_space<vmem>>, vector<8x8x16xf32>
    tpu.vector_store %arg7[%c2_13, %c2_14, %c0_15], %8 {strides = array<i32>} : memref<12x12x96xf32, #tpu.memory_space<vmem>>, vector<8x8x16xf32>,
    %cst_16 = arith.constant 0.000000e+00 : f32
    %10 = vector.broadcast %cst_16 : f32 to vector<8x8x16xf32>
    %c2_17 = arith.constant 2 : index
    %c2_18 = arith.constant 2 : index
    %c80 = arith.constant 80 : index
    %11 = vector.load %arg7[%c2_17, %c2_18, %c80] : memref<12x12x96xf32, #tpu.memory_space<vmem>>, vector<8x8x16xf32>
    tpu.vector_store %arg7[%c2_17, %c2_18, %c80], %10 {strides = array<i32>} : memref<12x12x96xf32, #tpu.memory_space<vmem>>, vector<8x8x16xf32>,
    %c0_19 = arith.constant 0 : index
    %c0_20 = arith.constant 0 : index
    %c0_21 = arith.constant 0 : index
    %c0_22 = arith.constant 0 : index
    %c0_23 = arith.constant 0 : index
    %12 = vector.load %arg2[%c0_19, %c0_20, %c0_21, %c0_22, %c0_23] : memref<1x1x8x8x64xf32, #tpu.memory_space<vmem>>, vector<1x1x8x8x64xf32>
    %13 = vector.shape_cast %12 : vector<1x1x8x8x64xf32> to vector<8x8x64xf32>
    %c0_24 = arith.constant 0 : index
    %c0_25 = arith.constant 0 : index
    %c0_26 = arith.constant 0 : index
    %14 = vector.load %arg3[%c0_24, %c0_25, %c0_26] : memref<1x1x64xf32, #tpu.memory_space<vmem>>, vector<1x1x64xf32>
    %15 = vector.shape_cast %14 : vector<1x1x64xf32> to vector<1x64xf32>
    %16 = vector.shape_cast %15 : vector<1x64xf32> to vector<1x1x64xf32>
    %17 = vector.broadcast %16 : vector<1x1x64xf32> to vector<8x8x64xf32>
    %18 = arith.mulf %13, %17 : vector<8x8x64xf32>
    %c0_27 = arith.constant 0 : index
    %c0_28 = arith.constant 0 : index
    %c0_29 = arith.constant 0 : index
    %19 = vector.load %arg4[%c0_27, %c0_28, %c0_29] : memref<1x1x64xf32, #tpu.memory_space<vmem>>, vector<1x1x64xf32>
    %20 = vector.shape_cast %19 : vector<1x1x64xf32> to vector<1x64xf32>
    %21 = vector.shape_cast %20 : vector<1x64xf32> to vector<1x1x64xf32>
    %22 = vector.broadcast %21 : vector<1x1x64xf32> to vector<8x8x64xf32>
    %23 = arith.addf %18, %22 : vector<8x8x64xf32>
    %cst_30 = arith.constant 0.000000e+00 : f32
    %24 = vector.broadcast %cst_30 : f32 to vector<8x8x64xf32>
    %25 = arith.maximumf %23, %24 : vector<8x8x64xf32>
    %c2_31 = arith.constant 2 : index
    %c2_32 = arith.constant 2 : index
    %c16 = arith.constant 16 : index
    %26 = vector.load %arg7[%c2_31, %c2_32, %c16] : memref<12x12x96xf32, #tpu.memory_space<vmem>>, vector<8x8x64xf32>
    tpu.vector_store %arg7[%c2_31, %c2_32, %c16], %25 {strides = array<i32>} : memref<12x12x96xf32, #tpu.memory_space<vmem>>, vector<8x8x64xf32>,
    %cst_33 = arith.constant 0.000000e+00 : f32
    %27 = vector.broadcast %cst_33 : f32 to vector<64x128xf32>
    %c0_34 = arith.constant 0 : index
    %c0_35 = arith.constant 0 : index
    %c0_36 = arith.constant 0 : index
    %28 = vector.load %arg7[%c0_34, %c0_35, %c0_36] : memref<12x12x96xf32, #tpu.memory_space<vmem>>, vector<8x8x96xf32>
    %29 = vector.shape_cast %28 : vector<8x8x96xf32> to vector<64x96xf32>
    %30 = arith.truncf %29 : vector<64x96xf32> to vector<64x96xbf16>
    %c0_37 = arith.constant 0 : index
    %c0_38 = arith.constant 0 : index
    %c0_39 = arith.constant 0 : index
    %c0_40 = arith.constant 0 : index
    %31 = vector.load %arg5[%c0_37, %c0_38, %c0_39, %c0_40] : memref<1x9x96x128xbf16, #tpu.memory_space<vmem>>, vector<1x1x96x128xbf16>
    %32 = vector.shape_cast %31 : vector<1x1x96x128xbf16> to vector<96x128xbf16>
    %cst_41 = arith.constant dense<0.000000e+00> : vector<64x128xf32>
    %33 = tpu.matmul %30, %32, %cst_41 {dimension_numbers = #tpu.dot_dimension_numbers<[1], [0], [0], [1], [0, 0, 1, 1], [], []>} : vector<64x96xbf16>, vector<96x128xbf16>, vector<64x128xf32> -> vector<64x128xf32>
    %34 = arith.addf %27, %33 : vector<64x128xf32>
    %c0_42 = arith.constant 0 : index
    %c2_43 = arith.constant 2 : index
    %c0_44 = arith.constant 0 : index
    %35 = vector.load %arg7[%c0_42, %c2_43, %c0_44] : memref<12x12x96xf32, #tpu.memory_space<vmem>>, vector<8x8x96xf32>
    %36 = vector.shape_cast %35 : vector<8x8x96xf32> to vector<64x96xf32>
    %37 = arith.truncf %36 : vector<64x96xf32> to vector<64x96xbf16>
    %c0_45 = arith.constant 0 : index
    %c1 = arith.constant 1 : index
    %c0_46 = arith.constant 0 : index
    %c0_47 = arith.constant 0 : index
    %38 = vector.load %arg5[%c0_45, %c1, %c0_46, %c0_47] : memref<1x9x96x128xbf16, #tpu.memory_space<vmem>>, vector<1x1x96x128xbf16>
    %39 = vector.shape_cast %38 : vector<1x1x96x128xbf16> to vector<96x128xbf16>
    %cst_48 = arith.constant dense<0.000000e+00> : vector<64x128xf32>
    %40 = tpu.matmul %37, %39, %cst_48 {dimension_numbers = #tpu.dot_dimension_numbers<[1], [0], [0], [1], [0, 0, 1, 1], [], []>} : vector<64x96xbf16>, vector<96x128xbf16>, vector<64x128xf32> -> vector<64x128xf32>
    %41 = arith.addf %34, %40 : vector<64x128xf32>
    %c0_49 = arith.constant 0 : index
    %c4 = arith.constant 4 : index
    %c0_50 = arith.constant 0 : index
    %42 = vector.load %arg7[%c0_49, %c4, %c0_50] : memref<12x12x96xf32, #tpu.memory_space<vmem>>, vector<8x8x96xf32>
    %43 = vector.shape_cast %42 : vector<8x8x96xf32> to vector<64x96xf32>
    %44 = arith.truncf %43 : vector<64x96xf32> to vector<64x96xbf16>
    %c0_51 = arith.constant 0 : index
    %c2_52 = arith.constant 2 : index
    %c0_53 = arith.constant 0 : index
    %c0_54 = arith.constant 0 : index
    %45 = vector.load %arg5[%c0_51, %c2_52, %c0_53, %c0_54] : memref<1x9x96x128xbf16, #tpu.memory_space<vmem>>, vector<1x1x96x128xbf16>
    %46 = vector.shape_cast %45 : vector<1x1x96x128xbf16> to vector<96x128xbf16>
    %cst_55 = arith.constant dense<0.000000e+00> : vector<64x128xf32>
    %47 = tpu.matmul %44, %46, %cst_55 {dimension_numbers = #tpu.dot_dimension_numbers<[1], [0], [0], [1], [0, 0, 1, 1], [], []>} : vector<64x96xbf16>, vector<96x128xbf16>, vector<64x128xf32> -> vector<64x128xf32>
    %48 = arith.addf %41, %47 : vector<64x128xf32>
    %c2_56 = arith.constant 2 : index
    %c0_57 = arith.constant 0 : index
    %c0_58 = arith.constant 0 : index
    %49 = vector.load %arg7[%c2_56, %c0_57, %c0_58] : memref<12x12x96xf32, #tpu.memory_space<vmem>>, vector<8x8x96xf32>
    %50 = vector.shape_cast %49 : vector<8x8x96xf32> to vector<64x96xf32>
    %51 = arith.truncf %50 : vector<64x96xf32> to vector<64x96xbf16>
    %c0_59 = arith.constant 0 : index
    %c3 = arith.constant 3 : index
    %c0_60 = arith.constant 0 : index
    %c0_61 = arith.constant 0 : index
    %52 = vector.load %arg5[%c0_59, %c3, %c0_60, %c0_61] : memref<1x9x96x128xbf16, #tpu.memory_space<vmem>>, vector<1x1x96x128xbf16>
    %53 = vector.shape_cast %52 : vector<1x1x96x128xbf16> to vector<96x128xbf16>
    %cst_62 = arith.constant dense<0.000000e+00> : vector<64x128xf32>
    %54 = tpu.matmul %51, %53, %cst_62 {dimension_numbers = #tpu.dot_dimension_numbers<[1], [0], [0], [1], [0, 0, 1, 1], [], []>} : vector<64x96xbf16>, vector<96x128xbf16>, vector<64x128xf32> -> vector<64x128xf32>
    %55 = arith.addf %48, %54 : vector<64x128xf32>
    %c2_63 = arith.constant 2 : index
    %c2_64 = arith.constant 2 : index
    %c0_65 = arith.constant 0 : index
    %56 = vector.load %arg7[%c2_63, %c2_64, %c0_65] : memref<12x12x96xf32, #tpu.memory_space<vmem>>, vector<8x8x96xf32>
    %57 = vector.shape_cast %56 : vector<8x8x96xf32> to vector<64x96xf32>
    %58 = arith.truncf %57 : vector<64x96xf32> to vector<64x96xbf16>
    %c0_66 = arith.constant 0 : index
    %c4_67 = arith.constant 4 : index
    %c0_68 = arith.constant 0 : index
    %c0_69 = arith.constant 0 : index
    %59 = vector.load %arg5[%c0_66, %c4_67, %c0_68, %c0_69] : memref<1x9x96x128xbf16, #tpu.memory_space<vmem>>, vector<1x1x96x128xbf16>
    %60 = vector.shape_cast %59 : vector<1x1x96x128xbf16> to vector<96x128xbf16>
    %cst_70 = arith.constant dense<0.000000e+00> : vector<64x128xf32>
    %61 = tpu.matmul %58, %60, %cst_70 {dimension_numbers = #tpu.dot_dimension_numbers<[1], [0], [0], [1], [0, 0, 1, 1], [], []>} : vector<64x96xbf16>, vector<96x128xbf16>, vector<64x128xf32> -> vector<64x128xf32>
    %62 = arith.addf %55, %61 : vector<64x128xf32>
    %c2_71 = arith.constant 2 : index
    %c4_72 = arith.constant 4 : index
    %c0_73 = arith.constant 0 : index
    %63 = vector.load %arg7[%c2_71, %c4_72, %c0_73] : memref<12x12x96xf32, #tpu.memory_space<vmem>>, vector<8x8x96xf32>
    %64 = vector.shape_cast %63 : vector<8x8x96xf32> to vector<64x96xf32>
    %65 = arith.truncf %64 : vector<64x96xf32> to vector<64x96xbf16>
    %c0_74 = arith.constant 0 : index
    %c5 = arith.constant 5 : index
    %c0_75 = arith.constant 0 : index
    %c0_76 = arith.constant 0 : index
    %66 = vector.load %arg5[%c0_74, %c5, %c0_75, %c0_76] : memref<1x9x96x128xbf16, #tpu.memory_space<vmem>>, vector<1x1x96x128xbf16>
    %67 = vector.shape_cast %66 : vector<1x1x96x128xbf16> to vector<96x128xbf16>
    %cst_77 = arith.constant dense<0.000000e+00> : vector<64x128xf32>
    %68 = tpu.matmul %65, %67, %cst_77 {dimension_numbers = #tpu.dot_dimension_numbers<[1], [0], [0], [1], [0, 0, 1, 1], [], []>} : vector<64x96xbf16>, vector<96x128xbf16>, vector<64x128xf32> -> vector<64x128xf32>
    %69 = arith.addf %62, %68 : vector<64x128xf32>
    %c4_78 = arith.constant 4 : index
    %c0_79 = arith.constant 0 : index
    %c0_80 = arith.constant 0 : index
    %70 = vector.load %arg7[%c4_78, %c0_79, %c0_80] : memref<12x12x96xf32, #tpu.memory_space<vmem>>, vector<8x8x96xf32>
    %71 = vector.shape_cast %70 : vector<8x8x96xf32> to vector<64x96xf32>
    %72 = arith.truncf %71 : vector<64x96xf32> to vector<64x96xbf16>
    %c0_81 = arith.constant 0 : index
    %c6 = arith.constant 6 : index
    %c0_82 = arith.constant 0 : index
    %c0_83 = arith.constant 0 : index
    %73 = vector.load %arg5[%c0_81, %c6, %c0_82, %c0_83] : memref<1x9x96x128xbf16, #tpu.memory_space<vmem>>, vector<1x1x96x128xbf16>
    %74 = vector.shape_cast %73 : vector<1x1x96x128xbf16> to vector<96x128xbf16>
    %cst_84 = arith.constant dense<0.000000e+00> : vector<64x128xf32>
    %75 = tpu.matmul %72, %74, %cst_84 {dimension_numbers = #tpu.dot_dimension_numbers<[1], [0], [0], [1], [0, 0, 1, 1], [], []>} : vector<64x96xbf16>, vector<96x128xbf16>, vector<64x128xf32> -> vector<64x128xf32>
    %76 = arith.addf %69, %75 : vector<64x128xf32>
    %c4_85 = arith.constant 4 : index
    %c2_86 = arith.constant 2 : index
    %c0_87 = arith.constant 0 : index
    %77 = vector.load %arg7[%c4_85, %c2_86, %c0_87] : memref<12x12x96xf32, #tpu.memory_space<vmem>>, vector<8x8x96xf32>
    %78 = vector.shape_cast %77 : vector<8x8x96xf32> to vector<64x96xf32>
    %79 = arith.truncf %78 : vector<64x96xf32> to vector<64x96xbf16>
    %c0_88 = arith.constant 0 : index
    %c7 = arith.constant 7 : index
    %c0_89 = arith.constant 0 : index
    %c0_90 = arith.constant 0 : index
    %80 = vector.load %arg5[%c0_88, %c7, %c0_89, %c0_90] : memref<1x9x96x128xbf16, #tpu.memory_space<vmem>>, vector<1x1x96x128xbf16>
    %81 = vector.shape_cast %80 : vector<1x1x96x128xbf16> to vector<96x128xbf16>
    %cst_91 = arith.constant dense<0.000000e+00> : vector<64x128xf32>
    %82 = tpu.matmul %79, %81, %cst_91 {dimension_numbers = #tpu.dot_dimension_numbers<[1], [0], [0], [1], [0, 0, 1, 1], [], []>} : vector<64x96xbf16>, vector<96x128xbf16>, vector<64x128xf32> -> vector<64x128xf32>
    %83 = arith.addf %76, %82 : vector<64x128xf32>
    %c4_92 = arith.constant 4 : index
    %c4_93 = arith.constant 4 : index
    %c0_94 = arith.constant 0 : index
    %84 = vector.load %arg7[%c4_92, %c4_93, %c0_94] : memref<12x12x96xf32, #tpu.memory_space<vmem>>, vector<8x8x96xf32>
    %85 = vector.shape_cast %84 : vector<8x8x96xf32> to vector<64x96xf32>
    %86 = arith.truncf %85 : vector<64x96xf32> to vector<64x96xbf16>
    %c0_95 = arith.constant 0 : index
    %c8 = arith.constant 8 : index
    %c0_96 = arith.constant 0 : index
    %c0_97 = arith.constant 0 : index
    %87 = vector.load %arg5[%c0_95, %c8, %c0_96, %c0_97] : memref<1x9x96x128xbf16, #tpu.memory_space<vmem>>, vector<1x1x96x128xbf16>
    %88 = vector.shape_cast %87 : vector<1x1x96x128xbf16> to vector<96x128xbf16>
    %cst_98 = arith.constant dense<0.000000e+00> : vector<64x128xf32>
    %89 = tpu.matmul %86, %88, %cst_98 {dimension_numbers = #tpu.dot_dimension_numbers<[1], [0], [0], [1], [0, 0, 1, 1], [], []>} : vector<64x96xbf16>, vector<96x128xbf16>, vector<64x128xf32> -> vector<64x128xf32>
    %90 = arith.addf %83, %89 : vector<64x128xf32>
    %91 = vector.shape_cast %90 : vector<64x128xf32> to vector<1x1x8x8x128xf32>
    %c0_99 = arith.constant 0 : index
    %c0_100 = arith.constant 0 : index
    %c0_101 = arith.constant 0 : index
    %c0_102 = arith.constant 0 : index
    %c0_103 = arith.constant 0 : index
    %92 = vector.load %arg6[%c0_99, %c0_100, %c0_101, %c0_102, %c0_103] : memref<1x1x8x8x128xf32, #tpu.memory_space<vmem>>, vector<1x1x8x8x128xf32>
    tpu.vector_store %arg6[%c0_99, %c0_100, %c0_101, %c0_102, %c0_103], %91 {strides = array<i32>} : memref<1x1x8x8x128xf32, #tpu.memory_space<vmem>>, vector<1x1x8x8x128xf32>,
    return
  }
  func.func @transform_0(%arg0: i32, %arg1: i32) -> (i32, i32, i32, i32, i32) {
    %c0_i32 = arith.constant 0 : i32
    %c0_i32_0 = arith.constant 0 : i32
    %c0_i32_1 = arith.constant 0 : i32
    %c0_i32_2 = arith.constant 0 : i32
    return %arg0, %arg1, %c0_i32, %c0_i32_0, %c0_i32_1 : i32, i32, i32, i32, i32
  }
  func.func @transform_1(%arg0: i32, %arg1: i32) -> (i32, i32, i32) {
    %c0_i32 = arith.constant 0 : i32
    %c0_i32_0 = arith.constant 0 : i32
    %c0_i32_1 = arith.constant 0 : i32
    return %arg1, %c0_i32, %c0_i32_0 : i32, i32, i32
  }
  func.func @transform_2(%arg0: i32, %arg1: i32) -> (i32, i32, i32) {
    %c0_i32 = arith.constant 0 : i32
    %c0_i32_0 = arith.constant 0 : i32
    %c0_i32_1 = arith.constant 0 : i32
    return %arg1, %c0_i32, %c0_i32_0 : i32, i32, i32
  }
  func.func @transform_3(%arg0: i32, %arg1: i32) -> (i32, i32, i32, i32) {
    %c0_i32 = arith.constant 0 : i32
    %c0_i32_0 = arith.constant 0 : i32
    %c0_i32_1 = arith.constant 0 : i32
    %c0_i32_2 = arith.constant 0 : i32
    return %arg1, %c0_i32, %c0_i32_0, %c0_i32_1 : i32, i32, i32, i32
  }
  func.func @transform_4(%arg0: i32, %arg1: i32) -> (i32, i32, i32, i32, i32) {
    %c0_i32 = arith.constant 0 : i32
    %c0_i32_0 = arith.constant 0 : i32
    %c0_i32_1 = arith.constant 0 : i32
    %c0_i32_2 = arith.constant 0 : i32
    return %arg0, %arg1, %c0_i32, %c0_i32_0, %c0_i32_1 : i32, i32, i32, i32, i32
  }
}

</mosaic_0001>

<bundles_post_ra>
// kernel: dilated_conv3d_block.1
= control target key start
LH: loop header
LB: loop body
LE: loop exit
PB: predicated region body
PF: predicated region fallthrough
CT: control target
= control target key end

     0   :  { %s2034_s15 = smov 0   ;;  %s2036_s16 = smov 0   ;;  %s2489_s0 = inlined_call_operand.vmem [shape: f32[2,1,8,8,64], index: 0, kind: input, shape index: {}]   ;;  %s2490_s1 = inlined_call_operand.vmem [shape: f32[1,1,64], index: 1, kind: input, shape index: {}]   ;;  %s2491_s2 = inlined_call_operand.vmem [shape: f32[1,1,64], index: 2, kind: input, shape index: {}]   ;;  %s2492_s3 = inlined_call_operand.vmem [shape: bf16[1,9,96,128], index: 3, kind: input, shape index: {}]   ;;  %s2493_s4 = inlined_call_operand.vmem [shape: f32[2,1,8,8,128], index: 4, kind: output, shape index: {}]  }
   0x1   :  { %s2038_s17 = smov 0  }
   0x2 LB: > { %s26_s18 = sadd.s32 1, %s2001_s16  ;;  %p1532_p0 = scmp.ge.s32.totalorder %s2005_s17, 1  ;;  %s2005_s17 = sphi %s2038_s17, %s14_s17   ;;  %s2001_s16 = sphi %s2036_s16, %s2495_s16   ;;  %s1997_s15 = sphi %s2034_s15, %s2494_s15  }
   0x3   : > { %p28_p1 = scmp.ge.s32.totalorder %s26_s18, 2  ;;  %p208_p2 = scmp.lt.s32.totalorder %s2005_s17, 3 }
   0x5   : > { %s2497_s18 = smov (%p28_p1, %s26_s18), 0  ;;  %p209_p3 = pnand %p1532_p0, %p208_p2 }
   0x6   : > { %p253_p4 = scmp.lt.s32.totalorder (!%p209_p3), %s1997_s15, 1  ;;  %s2008_s21 = smov (!%p209_p3), 16  }
   0x7   : > { %212 = sbr.rel (%p209_p3) target bundleno = 442 (0x1ba), region = 36 }
   0xc   : > { %v1900_v0 = vld [vmem:[%s2492_s3 + $0x58] sm:$0xff]  ;;  %s2499_s15 = smov (!%p253_p4, %s1997_s15), 1  ;;  %v1906_v1 = vld [vmem:[%s2492_s3 + $0x88] sm:$0xff]  ;;  %vm312_vm0 = vcmask 130048   ;;  %vm321_vm1 = vcmask 786048   ;;  %v1899_v3 = vld [vmem:[%s2492_s3 + $0x50] sm:$0xff] }
   0xd   : > { %v2063_v2 = vld [vmem:[%s2490_s1] ss:$0 sm:$0xff]  ;;  %510 = vmatpush.bf16.msra.mxu0 %v1900_v0  ;;  %v2007_v4 = vmov 0.0   ;;  %1943 = vmatpush.bf16.msra.mxu1 %v1900_v0  ;;  %s1887_s27 = sshll.u32 %s2499_s15, 6  ;;  %v1898_v7 = vld [vmem:[%s2492_s3 + $0x48] sm:$0xff]  ;;  %v1904_v18 = vld [vmem:[%s2492_s3 + $0x78] sm:$0xff] }
   0xe   : > { %313 = vst.msk [vmem:[#allocation2 + $0x22] sm:$0xff] %vm312_vm0, %v2007_v4  ;;  %689 = vmatpush.bf16.msra.mxu2 %v1906_v1  ;;  %v1905_v5 = vld [vmem:[%s2492_s3 + $0x80] sm:$0xff]  ;;  %s2081_s6 = scalar_lea.vmem %s2489_s0, %s1887_s27  ;;  %v1903_v28 = vld [vmem:[%s2492_s3 + $0x70] sm:$0xff]  ;;  %v1896_v34 = vld [vmem:[%s2492_s3 + $0x38] sm:$0xff]  ;;  %vm283_vm2 = vcmask 785408   ;;  %vm285_vm3 = vcmask 781312   ;;  %s2453_s7 = scalar_lea.vmem %s2493_s4, %s1887_s27 }
   0xf   : > { %322 = vst.msk [vmem:[#allocation2 + $0x22] sm:$0xff] %vm321_vm1, %v2007_v4  ;;  %v2086_v6 = vld [vmem:[%s2491_s2] ss:$0 sm:$0xff]  ;;  %v332_v8 = vld [vmem:[%s2081_s6 + $0x10] sm:$0xff]  ;;  %v333_v14 = vld [vmem:[%s2081_s6 + $0x18] sm:$0xff]  ;;  %vm295_vm4 = vcmask 779264  }
  0x10   : > { %314 = vst.msk [vmem:[#allocation2 + $0x32] sm:$0xff] %vm312_vm0, %v2007_v4  ;;  %v330_v9 = vld [vmem:[%s2081_s6] sm:$0xff]  ;;  %v344_v11 = vmul.f32 %v2063_v2, %v332_v8  ;;  %v331_v15 = vld [vmem:[%s2081_s6 + $0x8] sm:$0xff]  ;;  %v345_v17 = vmul.f32 %v2063_v2, %v333_v14  ;;  %v336_v32 = vld [vmem:[%s2081_s6 + $0x30] sm:$0xff]  ;;  %vm402_vm5 = vcmask 654464  }
  0x11   : > { %v334_v10 = vld [vmem:[%s2081_s6 + $0x20] sm:$0xff]  ;;  %315 = vst.msk [vmem:[#allocation2 + $0x42] sm:$0xff] %vm312_vm0, %v2007_v4  ;;  %v342_v12 = vmul.f32 %v2063_v2, %v330_v9  ;;  %v335_v16 = vld [vmem:[%s2081_s6 + $0x28] sm:$0xff]  ;;  %511 = vmatpush.bf16.msra.mxu0 %v1899_v3  ;;  %1944 = vmatpush.bf16.msra.mxu1 %v1899_v3  ;;  %v343_v22 = vmul.f32 %v2063_v2, %v331_v15  ;;  %v337_v33 = vld [vmem:[%s2081_s6 + $0x38] sm:$0xff] }
  0x12   : > { %v346_v13 = vmul.f32 %v2063_v2, %v334_v10  ;;  %316 = vst.msk [vmem:[#allocation2 + $0x52] sm:$0xff] %vm312_vm0, %v2007_v4  ;;  %690 = vmatpush.bf16.msra.mxu2 %v1905_v5  ;;  %v356_v19 = vadd.f32 %v2086_v6, %v344_v11  ;;  %v347_v23 = vmul.f32 %v2063_v2, %v335_v16  ;;  %v1897_v27 = vld [vmem:[%s2492_s3 + $0x40] sm:$0xff]  ;;  %v1895_v40 = vld [vmem:[%s2492_s3 + $0x30] sm:$0xff]  ;;  %v1902_v46 = vld [vmem:[%s2492_s3 + $0x68] sm:$0xff] }
  0x13   : > { %317 = vst.msk [vmem:[#allocation2 + $0x62] sm:$0xff] %vm312_vm0, %v2007_v4  ;;  %v354_v20 = vadd.f32 %v2086_v6, %v342_v12  ;;  %v357_v29 = vadd.f32 %v2086_v6, %v345_v17  ;;  %v355_v30 = vadd.f32 %v2086_v6, %v343_v22  ;;  %v348_v37 = vmul.f32 %v2063_v2, %v336_v32  ;;  %v1912_v47 = vld [vmem:[%s2492_s3 + $0xb8] sm:$0xff]  ;;  %v1901_v49 = vld [vmem:[%s2492_s3 + $0x60] sm:$0xff]  ;;  %v1911_v50 = vld [vmem:[%s2492_s3 + $0xb0] sm:$0xff] }
  0x14   : > { %v358_v21 = vadd.f32 %v2086_v6, %v346_v13  ;;  %318 = vst.msk [vmem:[#allocation2 + $0x72] sm:$0xff] %vm312_vm0, %v2007_v4  ;;  %v364_v24 = vmax.f32 %v356_v19, 0.0  ;;  %v359_v31 = vadd.f32 %v2086_v6, %v347_v23  ;;  %v349_v39 = vmul.f32 %v2063_v2, %v337_v33  ;;  %799 = vmatpush.bf16.msra.mxu3 %v1912_v47  ;;  %v1910_v55 = vld [vmem:[%s2492_s3 + $0xa8] sm:$0xff]  ;;  %v1909_v57 = vld [vmem:[%s2492_s3 + $0xa0] sm:$0xff]  ;;  %v1908_v59 = vld [vmem:[%s2492_s3 + $0x98] sm:$0xff] }
  0x15   : > { %319 = vst.msk [vmem:[#allocation2 + $0x82] sm:$0xff] %vm312_vm0, %v2007_v4  ;;  %v362_v25 = vmax.f32 %v354_v20, 0.0  ;;  %512 = vmatpush.bf16.msra.mxu0 %v1898_v7  ;;  %1945 = vmatpush.bf16.msra.mxu1 %v1898_v7  ;;  %v365_v35 = vmax.f32 %v357_v29, 0.0  ;;  %v363_v36 = vmax.f32 %v355_v30, 0.0  ;;  %v360_v41 = vadd.f32 %v2086_v6, %v348_v37  ;;  %v1918_v56 = vld [vmem:[%s2492_s3 + $0xe8] sm:$0xff]  ;;  %v1917_v58 = vld [vmem:[%s2492_s3 + $0xe0] sm:$0xff] }
  0x16   : > { %v366_v26 = vmax.f32 %v358_v21, 0.0  ;;  %320 = vst.msk [vmem:[#allocation2 + $0x92] sm:$0xff] %vm312_vm0, %v2007_v4  ;;  %691 = vmatpush.bf16.msra.mxu2 %v1904_v18  ;;  %382 = vrot.lane.b32.xlu0 %v364_v24, %s2008_s21  ;;  %v367_v38 = vmax.f32 %v359_v31, 0.0  ;;  %v361_v42 = vadd.f32 %v2086_v6, %v349_v39  ;;  %v1916_v60 = vld [vmem:[%s2492_s3 + $0xd8] sm:$0xff]  ;;  %v1907_v61 = vld [vmem:[%s2492_s3 + $0x90] sm:$0xff]  ;;  %v1914_v63 = vld [vmem:[%s2492_s3 + $0xc8] sm:$0xff] }
  0x17   : > { %323 = vst.msk [vmem:[#allocation2 + $0x32] sm:$0xff] %vm321_vm1, %v2007_v4  ;;  %378 = vrot.lane.b32.xlu2 %v362_v25, %s2008_s21  ;;  %v368_v43 = vmax.f32 %v360_v41, 0.0  ;;  %v1915_v62 = vld [vmem:[%s2492_s3 + $0xd0] sm:$0xff]  ;;  %v1913_v0 = vld [vmem:[%s2492_s3 + $0xc0] sm:$0xff]  ;;  %v1894_v3 = vld [vmem:[%s2492_s3 + $0x28] sm:$0xff] }
  0x18   : > { %324 = vst.msk [vmem:[#allocation2 + $0x42] sm:$0xff] %vm321_vm1, %v2007_v4  ;;  %386 = vrot.lane.b32.xlu1 %v366_v26, %s2008_s21  ;;  %v369_v44 = vmax.f32 %v361_v42, 0.0  ;;  %800 = vmatpush.bf16.msra.mxu3 %v1911_v50  ;;  %v1893_v5 = vld [vmem:[%s2492_s3 + $0x20] sm:$0xff]  ;;  %v1930_v14 = vld [vmem:[%s2492_s3 + $0x148] sm:$0xff]  ;;  %v1892_v15 = vld [vmem:[%s2492_s3 + $0x18] sm:$0xff] }
  0x19   : > { %325 = vst.msk [vmem:[#allocation2 + $0x52] sm:$0xff] %vm321_vm1, %v2007_v4  ;;  %513 = vmatpush.bf16.msra.mxu0 %v1897_v27  ;;  %1946 = vmatpush.bf16.msra.mxu1 %v1897_v27  ;;  %v1929_v16 = vld [vmem:[%s2492_s3 + $0x140] sm:$0xff]  ;;  %v1891_v19 = vld [vmem:[%s2492_s3 + $0x10] sm:$0xff]  ;;  %v1928_v20 = vld [vmem:[%s2492_s3 + $0x138] sm:$0xff] }
  0x1a   : > { %326 = vst.msk [vmem:[#allocation2 + $0x62] sm:$0xff] %vm321_vm1, %v2007_v4  ;;  %692 = vmatpush.bf16.msra.mxu2 %v1903_v28  ;;  %v1927_v21 = vld [vmem:[%s2492_s3 + $0x130] sm:$0xff]  ;;  %v1890_v22 = vld [vmem:[%s2492_s3 + $0x8] sm:$0xff]  ;;  %v1936_v26 = vld [vmem:[%s2492_s3 + $0x178] sm:$0xff] }
  0x1b   : > { %327 = vst.msk [vmem:[#allocation2 + $0x72] sm:$0xff] %vm321_vm1, %v2007_v4  ;;  %v1926_v25 = vld [vmem:[%s2492_s3 + $0x128] sm:$0xff]  ;;  %v1889_v27 = vld [vmem:[%s2492_s3] sm:$0xff]  ;;  %v1935_v29 = vld [vmem:[%s2492_s3 + $0x170] sm:$0xff] }
  0x1c   : > { %328 = vst.msk [vmem:[#allocation2 + $0x82] sm:$0xff] %vm321_vm1, %v2007_v4  ;;  %801 = vmatpush.bf16.msra.mxu3 %v1910_v55  ;;  %v1925_v28 = vld [vmem:[%s2492_s3 + $0x120] sm:$0xff]  ;;  %v1934_v41 = vld [vmem:[%s2492_s3 + $0x168] sm:$0xff]  ;;  %v1940_v47 = vld [vmem:[%s2492_s3 + $0x198] sm:$0xff] }
  0x1d   : > { %329 = vst.msk [vmem:[#allocation2 + $0x92] sm:$0xff] %vm321_vm1, %v2007_v4  ;;  %514 = vmatpush.bf16.msra.mxu0 %v1896_v34  ;;  %1947 = vmatpush.bf16.msra.mxu1 %v1896_v34  ;;  %v1942_v42 = vld [vmem:[%s2492_s3 + $0x1a8] sm:$0xff]  ;;  %v1931_v50 = vld [vmem:[%s2492_s3 + $0x150] sm:$0xff] }
  0x1e   : > { %384 = vrot.lane.b32.xlu0 %v365_v35, %s2008_s21  ;;  %284 = vst.msk [vmem:[#allocation2] sm:$0xff] %vm283_vm2, %v2007_v4  ;;  %693 = vmatpush.bf16.msra.mxu2 %v1902_v46  ;;  %v1932_v46 = vld [vmem:[%s2492_s3 + $0x158] sm:$0xff] }
  0x1f   : > { %380 = vrot.lane.b32.xlu2 %v363_v36, %s2008_s21  ;;  %286 = vst.msk [vmem:[#allocation2 + $0x8] sm:$0xf] %vm285_vm3, %v2007_v4 }
  0x20   : > { %388 = vrot.lane.b32.xlu1 %v367_v38, %s2008_s21  ;;  %287 = vst.msk [vmem:[#allocation2 + $0x10] sm:$0xff] %vm283_vm2, %v2007_v4  ;;  %802 = vmatpush.bf16.msra.mxu3 %v1909_v57 }
  0x21   : > { %515 = vmatpush.bf16.msra.mxu0 %v1895_v40  ;;  %1948 = vmatpush.bf16.msra.mxu1 %v1895_v40  ;;  %288 = vst.msk [vmem:[#allocation2 + $0x18] sm:$0xf] %vm285_vm3, %v2007_v4 }
  0x22   : > { %290 = vst.msk [vmem:[#allocation2 + $0xa0] sm:$0xff] %vm283_vm2, %v2007_v4  ;;  %694 = vmatpush.bf16.msra.mxu2 %v1901_v49 }
  0x23   : > { %291 = vst.msk [vmem:[#allocation2 + $0xa8] sm:$0xf] %vm285_vm3, %v2007_v4 }
  0x24   : > { %292 = vst.msk [vmem:[#allocation2 + $0xb0] sm:$0xff] %vm283_vm2, %v2007_v4  ;;  %803 = vmatpush.bf16.msra.mxu3 %v1908_v59 }
  0x25   : > { %293 = vst.msk [vmem:[#allocation2 + $0xb8] sm:$0xf] %vm285_vm3, %v2007_v4  ;;  %909 = vmatpush.bf16.msrb.mxu0 %v1918_v56  ;;  %587 = vmatpush.bf16.msrb.mxu1 %v1894_v3 }
  0x26   : > { %390 = vrot.lane.b32.xlu0 %v368_v43, %s2008_s21  ;;  %v435_v45 = vld [vmem:[#allocation2 + $0x2] sm:$0xff]  ;;  %304 = vst.msk [vmem:[#allocation2 + $0x2a] sm:$0x3] %vm295_vm4, %v2007_v4  ;;  %1130 = vmatpush.bf16.msrb.mxu2 %v1930_v14  ;;  %v1924_v43 = vld [vmem:[%s2492_s3 + $0x118] sm:$0xff] }
  0x27   : > { %v614_v52 = vld [vmem:[#allocation2 + $0x4] sm:$0xff]  ;;  %305 = vst.msk [vmem:[#allocation2 + $0x3a] sm:$0x3] %vm295_vm4, %v2007_v4 }
  0x28   : > { %392 = vrot.lane.b32.xlu1 %v369_v44, %s2008_s21  ;;  %v436_v48 = vld [vmem:[#allocation2 + $0x12] sm:$0xff]  ;;  %296 = vst.msk [vmem:[#allocation2 + $0x20] sm:$0x3] %vm295_vm4, %v2007_v4  ;;  %804 = vmatpush.bf16.msra.mxu3 %v1907_v61  ;;  %v1933_v44 = vld [vmem:[%s2492_s3 + $0x160] sm:$0xff]  ;;  %v1922_v61 = vld [vmem:[%s2492_s3 + $0x108] sm:$0xff] }
  0x29   : > { %v443_v51 = vpack.c.bf16 %v436_v48, %v435_v45  ;;  %v615_v53 = vld [vmem:[#allocation2 + $0x14] sm:$0xff]  ;;  %910 = vmatpush.bf16.msrb.mxu0 %v1917_v58  ;;  %297 = vst.msk [vmem:[#allocation2 + $0x30] sm:$0x3] %vm295_vm4, %v2007_v4  ;;  %588 = vmatpush.bf16.msrb.mxu1 %v1893_v5  ;;  %v1941_v45 = vld [vmem:[%s2492_s3 + $0x1a0] sm:$0xff] }
  0x2a   : > { %v622_v54 = vpack.c.bf16 %v615_v53, %v614_v52  ;;  %298 = vst.msk [vmem:[#allocation2 + $0x40] sm:$0x3] %vm295_vm4, %v2007_v4  ;;  %1131 = vmatpush.bf16.msrb.mxu2 %v1929_v16  ;;  %v1923_v48 = vld [vmem:[%s2492_s3 + $0x110] sm:$0xff]  ;;  %v1061_v14 = vld [vmem:[#allocation2 + $0xa0] sm:$0xff] }
  0x2b   : > { %1573 = vmatmul.msk.bf16.vlgmr.msra.gmra.mxu0 %vm283_vm2, %v443_v51  ;;  %299 = vst.msk [vmem:[#allocation2 + $0x50] sm:$0x3] %vm295_vm4, %v2007_v4  ;;  %v1939_v51 = vld [vmem:[%s2492_s3 + $0x190] sm:$0xff] }
  0x2c   : > { %1641 = vmatmul.msk.bf16.vlgmr.msra.gmra.mxu2 %vm283_vm2, %v622_v54  ;;  %300 = vst.msk [vmem:[#allocation2 + $0x60] sm:$0x3] %vm295_vm4, %v2007_v4  ;;  %1240 = vmatpush.bf16.msrb.mxu3 %v1936_v26 }
  0x2d   : > { %911 = vmatpush.bf16.msrb.mxu0 %v1916_v60  ;;  %301 = vst.msk [vmem:[#allocation2 + $0x70] sm:$0x3] %vm295_vm4, %v2007_v4  ;;  %589 = vmatpush.bf16.msrb.mxu1 %v1892_v15  ;;  %v1938_v60 = vld [vmem:[%s2492_s3 + $0x188] sm:$0xff]  ;;  %v1062_v15 = vld [vmem:[#allocation2 + $0xb0] sm:$0xff] }
  0x2e   : > { %302 = vst.msk [vmem:[#allocation2 + $0x80] sm:$0x3] %vm295_vm4, %v2007_v4  ;;  %1132 = vmatpush.bf16.msrb.mxu2 %v1928_v20  ;;  %v1172_v20 = vld [vmem:[#allocation2 + $0xb2] sm:$0xff] }
  0x2f   : > { %303 = vst.msk [vmem:[#allocation2 + $0x90] sm:$0x3] %vm295_vm4, %v2007_v4 }
  0x30   : > { %306 = vst.msk [vmem:[#allocation2 + $0x4a] sm:$0x3] %vm295_vm4, %v2007_v4  ;;  %1241 = vmatpush.bf16.msrb.mxu3 %v1935_v29 }
  0x31   : > { %912 = vmatpush.bf16.msrb.mxu0 %v1915_v62  ;;  %307 = vst.msk [vmem:[#allocation2 + $0x5a] sm:$0x3] %vm295_vm4, %v2007_v4  ;;  %590 = vmatpush.bf16.msrb.mxu1 %v1891_v19  ;;  %v1937_v62 = vld [vmem:[%s2492_s3 + $0x180] sm:$0xff] }
  0x32   : > { %308 = vst.msk [vmem:[#allocation2 + $0x6a] sm:$0x3] %vm295_vm4, %v2007_v4  ;;  %1133 = vmatpush.bf16.msrb.mxu2 %v1927_v21  ;;  %v1171_v19 = vld [vmem:[#allocation2 + $0xa2] sm:$0xff] }
  0x33   : > { %309 = vst.msk [vmem:[#allocation2 + $0x7a] sm:$0x3] %vm295_vm4, %v2007_v4  ;;  %v1176_v21 = vpack.c.bf16 %v1172_v20, %v1171_v19 }
  0x34   : > { %310 = vst.msk [vmem:[#allocation2 + $0x8a] sm:$0x3] %vm295_vm4, %v2007_v4  ;;  %1242 = vmatpush.bf16.msrb.mxu3 %v1934_v41 }
  0x35   : > { %913 = vmatpush.bf16.msrb.mxu0 %v1914_v63  ;;  %311 = vst.msk [vmem:[#allocation2 + $0x9a] sm:$0x3] %vm295_vm4, %v2007_v4  ;;  %591 = vmatpush.bf16.msrb.mxu1 %v1890_v22  ;;  %v411_v63 = vld [vmem:[#allocation2] sm:$0xff] }
  0x36   : > { %1134 = vmatpush.bf16.msrb.mxu2 %v1926_v25  ;;  %v1281_v22 = vld [vmem:[#allocation2 + $0xa4] sm:$0xff] }
  0x38   : > { %1243 = vmatpush.bf16.msrb.mxu3 %v1933_v44 }
  0x39   : > { %914 = vmatpush.bf16.msrb.mxu0 %v1913_v0  ;;  %592 = vmatpush.bf16.msrb.mxu1 %v1889_v27  ;;  %v412_v0 = vld [vmem:[#allocation2 + $0x10] sm:$0xff] }
  0x3a   : > { %1135 = vmatpush.bf16.msrb.mxu2 %v1925_v28  ;;  %v419_v3 = vpack.c.bf16 %v412_v0, %v411_v63 }
  0x3c   : > { %1244 = vmatpush.bf16.msrb.mxu3 %v1932_v46 }
  0x3d   : > { %1350 = vmatpush.bf16.msra.mxu0 %v1942_v42 }
  0x3e   : > { %1949 = vmatpush.bf16.msra.mxu2 %v1942_v42 }
  0x40   : > { %1245 = vmatpush.bf16.msrb.mxu3 %v1931_v50 }
  0x41   : > { %1351 = vmatpush.bf16.msra.mxu0 %v1941_v45 }
  0x42   : > { %1950 = vmatpush.bf16.msra.mxu2 %v1941_v45 }
  0x45   : > { %1352 = vmatpush.bf16.msra.mxu0 %v1940_v47 }
  0x46   : > { %1951 = vmatpush.bf16.msra.mxu2 %v1940_v47 }
  0x49   : > { %1353 = vmatpush.bf16.msra.mxu0 %v1939_v51 }
  0x4a   : > { %1952 = vmatpush.bf16.msra.mxu2 %v1939_v51 }
  0x4d   : > { %1354 = vmatpush.bf16.msra.mxu0 %v1938_v60 }
  0x4e   : > { %1953 = vmatpush.bf16.msra.mxu2 %v1938_v60 }
  0x51   : > { %1355 = vmatpush.bf16.msra.mxu0 %v1937_v62 }
  0x52   : > { %1954 = vmatpush.bf16.msra.mxu2 %v1937_v62 }
  0x71   : > { %v379_v1 = vpop.permute.xlu2 %378 }
  0x72   : > { %403 = vst.msk [vmem:[#allocation2 + $0x22] sm:$0xff] %vm402_vm5, %v379_v1 }
  0x79   : > { %v381_v2 = vpop.permute.xlu2 %380  ;;  %v437_v6 = vld [vmem:[#allocation2 + $0x22] sm:$0xff] }
  0x7a   : > { %404 = vst.msk [vmem:[#allocation2 + $0x32] sm:$0xff] %vm402_vm5, %v381_v2  ;;  %v616_v7 = vld [vmem:[#allocation2 + $0x24] sm:$0xff] }
  0x7b   : > { %v724_v8 = vld [vmem:[#allocation2 + $0x20] sm:$0xff] }
  0x81   : > { %v438_v9 = vld [vmem:[#allocation2 + $0x32] sm:$0xff] }
  0x82   : > { %v617_v4 = vld [vmem:[#allocation2 + $0x34] sm:$0xff]  ;;  %v444_v11 = vpack.c.bf16 %v438_v9, %v437_v6  ;;  %v1921_v6 = vld [vmem:[%s2492_s3 + $0x100] sm:$0xff] }
  0x83   : > { %v725_v10 = vld [vmem:[#allocation2 + $0x30] sm:$0xff]  ;;  %v2262_v12 = vpack.c.bf16 %v617_v4, %v616_v7  ;;  %v1920_v4 = vld [vmem:[%s2492_s3 + $0xf8] sm:$0xff] }
  0x84   : > { %v2264_v13 = vpack.c.bf16 %v725_v10, %v724_v8  ;;  %1574 = vmatmul.msk.bf16.gmra.mxu0 %vm283_vm2, %v444_v11  ;;  %v1919_v10 = vld [vmem:[%s2492_s3 + $0xf0] sm:$0xff] }
  0x85   : > { %1642 = vmatmul.msk.bf16.gmra.mxu2 %vm283_vm2, %v2262_v12 }
  0x86   : > { %1681 = vmatmul.msk.bf16.vlgmr.msra.gmra.mxu3 %vm283_vm2, %v2264_v13 }
  0x88   : > { %v383_v17 = vpop.permute.xlu0 %382 }
  0x89   : > { %405 = vst.msk [vmem:[#allocation2 + $0x42] sm:$0xff] %vm402_vm5, %v383_v17  ;;  %v1066_v17 = vpack.c.bf16 %v1062_v15, %v1061_v14 }
  0x8a   : > { %v387_v18 = vpop.permute.xlu1 %386 }
  0x8b   : > { %407 = vst.msk [vmem:[#allocation2 + $0x62] sm:$0xff] %vm402_vm5, %v387_v18 }
  0x90   : > { %v385_v23 = vpop.permute.xlu0 %384  ;;  %v439_v30 = vld [vmem:[#allocation2 + $0x42] sm:$0xff] }
  0x91   : > { %406 = vst.msk [vmem:[#allocation2 + $0x52] sm:$0xff] %vm402_vm5, %v385_v23  ;;  %v618_v31 = vld [vmem:[#allocation2 + $0x44] sm:$0xff]  ;;  %v1282_v23 = vld [vmem:[#allocation2 + $0xb4] sm:$0xff] }
  0x92   : > { %v389_v24 = vpop.permute.xlu1 %388  ;;  %v726_v32 = vld [vmem:[#allocation2 + $0x40] sm:$0xff] }
  0x93   : > { %408 = vst.msk [vmem:[#allocation2 + $0x72] sm:$0xff] %vm402_vm5, %v389_v24  ;;  %v441_v49 = vld [vmem:[#allocation2 + $0x62] sm:$0xff]  ;;  %v1286_v24 = vpack.c.bf16 %v1282_v23, %v1281_v22 }
  0x94   : > { %1721 = vmatmul.msk.bf16.vlgmr.msrb.gmra.mxu0 %vm283_vm2, %v444_v11  ;;  %v620_v53 = vld [vmem:[#allocation2 + $0x64] sm:$0xff] }
  0x95   : > { %v728_v55 = vld [vmem:[#allocation2 + $0x60] sm:$0xff] }
  0x98   : > { %v440_v33 = vld [vmem:[#allocation2 + $0x52] sm:$0xff]  ;;  %v391_v36 = vpop.permute.xlu0 %390 }
  0x99   : > { %v619_v34 = vld [vmem:[#allocation2 + $0x54] sm:$0xff]  ;;  %v2312_v37 = vpack.c.bf16 %v440_v33, %v439_v30  ;;  %409 = vst.msk [vmem:[#allocation2 + $0x82] sm:$0xff] %vm402_vm5, %v391_v36 }
  0x9a   : > { %v727_v35 = vld [vmem:[#allocation2 + $0x50] sm:$0xff]  ;;  %v2314_v38 = vpack.c.bf16 %v619_v34, %v618_v31  ;;  %v393_v40 = vpop.permute.xlu1 %392 }
  0x9b   : > { %v2316_v39 = vpack.c.bf16 %v727_v35, %v726_v32  ;;  %410 = vst.msk [vmem:[#allocation2 + $0x92] sm:$0xff] %vm402_vm5, %v393_v40  ;;  %1575 = vmatmul.msk.bf16.vlgmr.msra.gmra.mxu1 %vm283_vm2, %v2312_v37  ;;  %v442_v52 = vld [vmem:[#allocation2 + $0x72] sm:$0xff] }
  0x9c   : > { %1643 = vmatmul.msk.bf16.gmra.mxu2 %vm283_vm2, %v2314_v38  ;;  %1019 = vmatpush.bf16.msra.mxu1 %v1924_v43  ;;  %v621_v54 = vld [vmem:[#allocation2 + $0x74] sm:$0xff]  ;;  %v446_v57 = vpack.c.bf16 %v442_v52, %v441_v49 }
  0x9d   : > { %1682 = vmatmul.msk.bf16.gmra.mxu3 %vm283_vm2, %v2316_v39  ;;  %v729_v56 = vld [vmem:[#allocation2 + $0x70] sm:$0xff]  ;;  %v2358_v58 = vpack.c.bf16 %v621_v54, %v620_v53 }
  0x9e   : > { %v734_v59 = vpack.c.bf16 %v729_v56, %v728_v55 }
  0xa0   : > { %1020 = vmatpush.bf16.msra.mxu1 %v1923_v48  ;;  %v730_v1 = vld [vmem:[#allocation2 + $0x80] sm:$0xff] }
  0xa1   : > { %v840_v7 = vld [vmem:[#allocation2 + $0x82] sm:$0xff] }
  0xa2   : > { %v731_v2 = vld [vmem:[#allocation2 + $0x90] sm:$0xff]  ;;  %v1279_v11 = vld [vmem:[#allocation2 + $0x84] sm:$0xff] }
  0xa3   : > { %v735_v5 = vpack.c.bf16 %v731_v2, %v730_v1  ;;  %v841_v8 = vld [vmem:[#allocation2 + $0x92] sm:$0xff] }
  0xa4   : > { %1722 = vmatmul.msk.bf16.gmra.mxu0 %vm283_vm2, %v2312_v37  ;;  %1021 = vmatpush.bf16.msra.mxu1 %v1922_v61  ;;  %v845_v9 = vpack.c.bf16 %v841_v8, %v840_v7 }
  0xa8   : > { %1022 = vmatpush.bf16.msra.mxu1 %v1921_v6  ;;  %v517_v18 = vpop.f32.mrf.mxu0 }
  0xab   : > { %1576 = vmatmul.msk.bf16.gmra.mxu1 %vm283_vm2, %v446_v57 }
  0xac   : > { %1644 = vmatmul.msk.bf16.gmra.mxu2 %vm283_vm2, %v2358_v58  ;;  %1023 = vmatpush.bf16.msra.mxu1 %v1920_v4 }
  0xad   : > { %1683 = vmatmul.msk.bf16.gmra.mxu3 %vm283_vm2, %v734_v59 }
  0xaf   : > { %v696_v26 = vpop.f32.mrf.mxu2 }
  0xb0   : > { %1024 = vmatpush.bf16.msra.mxu1 %v1919_v10  ;;  %v519_v25 = vpop.f32.mrf.mxu0 }
  0xb4   : > { %1723 = vmatmul.msk.bf16.gmra.mxu0 %vm283_vm2, %v446_v57 }
  0xb7   : > { %v698_v29 = vpop.f32.mrf.mxu2 }
  0xbb   : > { %1601 = vmatmul.msk.bf16.vlgmr.msrb.gmra.mxu1 %vm283_vm2, %v419_v3 }
  0xbc   : > { %1801 = vmatmul.msk.bf16.vlgmr.msrb.gmra.mxu2 %vm283_vm2, %v2316_v39 }
  0xbd   : > { %1684 = vmatmul.msk.bf16.gmra.mxu3 %vm283_vm2, %v735_v5 }
  0xc4   : > { %1724 = vmatmul.msk.bf16.gmra.mxu0 %vm283_vm2, %v845_v9 }
  0xcb   : > { %1602 = vmatmul.msk.bf16.gmra.mxu1 %vm283_vm2, %v2264_v13  ;;  %v1280_v13 = vld [vmem:[#allocation2 + $0x94] sm:$0xff] }
  0xcc   : > { %1802 = vmatmul.msk.bf16.gmra.mxu2 %vm283_vm2, %v734_v59  ;;  %v1285_v16 = vpack.c.bf16 %v1280_v13, %v1279_v11 }
  0xcd   : > { %1841 = vmatmul.msk.bf16.vlgmr.msrb.gmra.mxu3 %vm283_vm2, %v2312_v37 }
  0xd4   : > { %1881 = vmatmul.msk.bf16.vlgmr.msra.gmra.mxu0 %vm283_vm2, %v2314_v38 }
  0xdb   : > { %1603 = vmatmul.msk.bf16.gmra.mxu1 %vm283_vm2, %v2316_v39 }
  0xdc   : > { %1803 = vmatmul.msk.bf16.gmra.mxu2 %vm283_vm2, %v735_v5 }
  0xdd   : > { %1842 = vmatmul.msk.bf16.gmra.mxu3 %vm283_vm2, %v446_v57 }
  0xe4   : > { %1882 = vmatmul.msk.bf16.gmra.mxu0 %vm283_vm2, %v2358_v58 }
  0xeb   : > { %1604 = vmatmul.msk.bf16.gmra.mxu1 %vm283_vm2, %v734_v59 }
  0xec   : > { %1804 = vmatmul.msk.bf16.gmra.mxu2 %vm283_vm2, %v1066_v17 }
  0xed   : > { %1843 = vmatmul.msk.bf16.gmra.mxu3 %vm283_vm2, %v845_v9 }
  0xf4   : > { %1883 = vmatmul.msk.bf16.gmra.mxu0 %vm283_vm2, %v1285_v16 }
  0xfb   : > { %1761 = vmatmul.msk.bf16.vlgmr.msra.gmra.mxu1 %vm283_vm2, %v2262_v12 }
  0xfc   : > { %1884 = vmatmul.msk.bf16.vlgmr.msra.gmra.mxu2 %vm283_vm2, %v1286_v24 }
  0xfd   : > { %1844 = vmatmul.msk.bf16.gmra.mxu3 %vm283_vm2, %v1176_v21 }
 0x101   : > { %v522_v27 = vpop.f32.mrf.mxu0 }
 0x108   : > { %v701_v32 = vpop.f32.mrf.mxu2 }
 0x109   : > { %v2411_v12 = vpop.f32.mrf.mxu0  ;;  %v806_v30 = vpop.f32.mrf.mxu3 }
 0x10b   : > { %1762 = vmatmul.msk.bf16.gmra.mxu1 %vm283_vm2, %v2314_v38 }
 0x110   : > { %v2416_v36 = vpop.f32.mrf.mxu2 }
 0x111   : > { %v916_v33 = vpop.f32.mrf.mxu0  ;;  %v808_v35 = vpop.f32.mrf.mxu3 }
 0x118   : > { %v527_v28 = vpop.f32.mrf.mxu1 }
 0x119   : > { %v918_v37 = vpop.f32.mrf.mxu0 }
 0x11b   : > { %1763 = vmatmul.msk.bf16.gmra.mxu1 %vm283_vm2, %v2358_v58 }
 0x11f   : > { %v706_v40 = vpop.f32.mrf.mxu2 }
 0x120   : > { %v529_v31 = vpop.f32.mrf.mxu1  ;;  %v811_v39 = vpop.f32.mrf.mxu3 }
 0x121   : > { %v2418_v41 = vpop.f32.mrf.mxu0 }
 0x127   : > { %v708_v45 = vpop.f32.mrf.mxu2 }
 0x128   : > { %v532_v34 = vpop.f32.mrf.mxu1  ;;  %v2420_v43 = vpop.f32.mrf.mxu3 }
 0x129   : > { %v2422_v46 = vpop.f32.mrf.mxu0 }
 0x12b   : > { %1764 = vmatmul.msk.bf16.gmra.mxu1 %vm283_vm2, %v1285_v16 }
 0x12f   : > { %v711_v49 = vpop.f32.mrf.mxu2 }
 0x130   : > { %v534_v38 = vpop.f32.mrf.mxu1  ;;  %v2424_v47 = vpop.f32.mrf.mxu3 }
 0x131   : > { %v2426_v50 = vpop.f32.mrf.mxu0 }
 0x137   : > { %v713_v53 = vpop.f32.mrf.mxu2 }
 0x138   : > { %v594_v42 = vpop.f32.mrf.mxu1  ;;  %v2428_v52 = vpop.f32.mrf.mxu3 }
 0x139   : > { %v2430_v54 = vpop.f32.mrf.mxu0  ;;  %v595_v6 = vadd.f32 %v594_v42, %v517_v18 }
 0x13b   : > { %v716_v8 = vadd.f32 %v696_v26, %v595_v6 }
 0x13d   : > { %v826_v14 = vadd.f32 %v806_v30, %v716_v8 }
 0x13f   : > { %v1137_v59 = vpop.f32.mrf.mxu2  ;;  %v936_v19 = vadd.f32 %v916_v33, %v826_v14 }
 0x140   : > { %v596_v44 = vpop.f32.mrf.mxu1  ;;  %v2432_v57 = vpop.f32.mrf.mxu3 }
 0x141   : > { %v2436_v60 = vpop.f32.mrf.mxu0  ;;  %v597_v11 = vadd.f32 %v596_v44, %v519_v25 }
 0x143   : > { %v717_v17 = vadd.f32 %v698_v29, %v597_v11 }
 0x145   : > { %v827_v24 = vadd.f32 %v808_v35, %v717_v17 }
 0x147   : > { %v1139_v3 = vpop.f32.mrf.mxu2  ;;  %v937_v29 = vadd.f32 %v918_v37, %v827_v24 }
 0x148   : > { %v599_v48 = vpop.f32.mrf.mxu1  ;;  %v2440_v0 = vpop.f32.mrf.mxu3 }
 0x149   : > { %v2442_v5 = vpop.f32.mrf.mxu0  ;;  %v600_v23 = vadd.f32 %v599_v48, %v522_v27 }
 0x14b   : > { %v718_v30 = vadd.f32 %v701_v32, %v600_v23 }
 0x14f   : > { %v1142_v15 = vpop.f32.mrf.mxu2 }
 0x150   : > { %v601_v51 = vpop.f32.mrf.mxu1  ;;  %v1247_v9 = vpop.f32.mrf.mxu3 }
 0x151   : > { %v1357_v16 = vpop.f32.mrf.mxu0  ;;  %v602_v27 = vadd.f32 %v601_v51, %v2411_v12 }
 0x157   : > { %v1144_v25 = vpop.f32.mrf.mxu2 }
 0x158   : > { %v604_v55 = vpop.f32.mrf.mxu1  ;;  %v1249_v21 = vpop.f32.mrf.mxu3 }
 0x159   : > { %v605_v56 = vadd.f32 %v604_v55, %v527_v28  ;;  %v1359_v26 = vpop.f32.mrf.mxu0 }
 0x15b   : > { %v2434_v58 = vadd.f32 %v706_v40, %v605_v56  ;;  %v828_v40 = vadd.f32 %v811_v39, %v718_v30 }
 0x15f   : > { %v1147_v44 = vpop.f32.mrf.mxu2 }
 0x160   : > { %v606_v61 = vpop.f32.mrf.mxu1  ;;  %v1252_v35 = vpop.f32.mrf.mxu3 }
 0x161   : > { %v607_v62 = vadd.f32 %v606_v61, %v529_v31  ;;  %v1362_v32 = vpop.f32.mrf.mxu0 }
 0x163   : > { %v2438_v63 = vadd.f32 %v708_v45, %v607_v62  ;;  %v719_v45 = vadd.f32 %v2416_v36, %v602_v27 }
 0x165   : > { %v829_v56 = vadd.f32 %v2420_v43, %v719_v45  ;;  %v831_v11 = vadd.f32 %v2428_v52, %v2438_v63 }
 0x167   : > { %v939_v39 = vadd.f32 %v2422_v46, %v829_v56  ;;  %v1149_v61 = vpop.f32.mrf.mxu2 }
 0x168   : > { %v609_v1 = vpop.f32.mrf.mxu1 }
 0x169   : > { %v610_v2 = vadd.f32 %v609_v1, %v532_v34  ;;  %v1364_v1 = vpop.f32.mrf.mxu0 }
 0x16b   : > { %v2444_v7 = vadd.f32 %v711_v49, %v610_v2  ;;  %v938_v49 = vadd.f32 %v2418_v41, %v828_v40  ;;  %v830_v41 = vadd.f32 %v2424_v47, %v2434_v58  ;;  %v941_v47 = vadd.f32 %v2430_v54, %v831_v11 }
 0x16d   : > { %v940_v43 = vadd.f32 %v2426_v50, %v830_v41 }
 0x170   : > { %v611_v4 = vpop.f32.mrf.mxu1 }
 0x171   : > { %v612_v10 = vadd.f32 %v611_v4, %v534_v38  ;;  %v1367_v14 = vpop.f32.mrf.mxu0 }
 0x173   : > { %v2446_v13 = vadd.f32 %v713_v53, %v612_v10 }
 0x178   : > { %v1026_v20 = vpop.f32.mrf.mxu1 }
 0x179   : > { %v1046_v22 = vadd.f32 %v1026_v20, %v936_v19  ;;  %v1369_v23 = vpop.f32.mrf.mxu0 }
 0x17b   : > { %v1157_v18 = vadd.f32 %v1137_v59, %v1046_v22  ;;  %v1254_v59 = vpop.f32.mrf.mxu3 }
 0x17d   : > { %v1267_v28 = vadd.f32 %v1247_v9, %v1157_v18  ;;  %v1152_v9 = vpop.f32.mrf.mxu2 }
 0x17f   : > { %v1377_v31 = vadd.f32 %v1357_v16, %v1267_v28 }
 0x180   : > { %v1028_v33 = vpop.f32.mrf.mxu1 }
 0x181   : > { %1385 = vst [vmem:[%s2453_s7] sm:$0xff] %v1377_v31  ;;  %v1047_v34 = vadd.f32 %v1028_v33, %v937_v29 }
 0x183   : > { %v1158_v38 = vadd.f32 %v1139_v3, %v1047_v34  ;;  %v1257_v6 = vpop.f32.mrf.mxu3 }
 0x185   : > { %v1268_v42 = vadd.f32 %v1249_v21, %v1158_v38  ;;  %v1154_v20 = vpop.f32.mrf.mxu2  ;;  %v832_v21 = vadd.f32 %v2432_v57, %v2444_v7 }
 0x187   : > { %v1378_v48 = vadd.f32 %v1359_v26, %v1268_v42  ;;  %v942_v52 = vadd.f32 %v2436_v60, %v832_v21 }
 0x188   : > { %v1031_v53 = vpop.f32.mrf.mxu1 }
 0x189   : > { %1386 = vst [vmem:[%s2453_s7 + $0x8] sm:$0xff] %v1378_v48  ;;  %v1048_v37 = vadd.f32 %v1031_v53, %v938_v49 }
 0x18b   : > { %v1159_v55 = vadd.f32 %v1142_v15, %v1048_v37  ;;  %v1259_v19 = vpop.f32.mrf.mxu3 }
 0x18d   : > { %v1269_v12 = vadd.f32 %v1252_v35, %v1159_v55  ;;  %v1372_v26 = vpop.f32.mrf.mxu2 }
 0x18f   : > { %v1379_v51 = vadd.f32 %v1362_v32, %v1269_v12 }
 0x190   : > { %v1033_v62 = vpop.f32.mrf.mxu1 }
 0x191   : > { %1387 = vst [vmem:[%s2453_s7 + $0x10] sm:$0xff] %v1379_v51  ;;  %v1049_v36 = vadd.f32 %v1033_v62, %v939_v39 }
 0x193   : > { %v1160_v2 = vadd.f32 %v1144_v25, %v1049_v36  ;;  %v1262_v54 = vpop.f32.mrf.mxu3  ;;  %v833_v25 = vadd.f32 %v2440_v0, %v2446_v13 }
 0x195   : > { %v1270_v3 = vadd.f32 %v1254_v59, %v1160_v2  ;;  %v943_v57 = vadd.f32 %v2442_v5, %v833_v25  ;;  %v1374_v27 = vpop.f32.mrf.mxu2 }
 0x197   : > { %v1380_v8 = vadd.f32 %v1364_v1, %v1270_v3 }
 0x198   : > { %v1036_v4 = vpop.f32.mrf.mxu1 }
 0x199   : > { %1388 = vst [vmem:[%s2453_s7 + $0x18] sm:$0xff] %v1380_v8  ;;  %v1050_v10 = vadd.f32 %v1036_v4, %v940_v43 }
 0x19b   : > { %v1161_v46 = vadd.f32 %v1147_v44, %v1050_v10  ;;  %v1264_v34 = vpop.f32.mrf.mxu3 }
 0x19d   : > { %v1271_v15 = vadd.f32 %v1257_v6, %v1161_v46 }
 0x19f   : > { %v1381_v16 = vadd.f32 %v1367_v14, %v1271_v15 }
 0x1a0   : > { %v1038_v58 = vpop.f32.mrf.mxu1 }
 0x1a1   : > { %1389 = vst [vmem:[%s2453_s7 + $0x20] sm:$0xff] %v1381_v16  ;;  %v1051_v17 = vadd.f32 %v1038_v58, %v941_v47 }
 0x1a3   : > { %v1162_v50 = vadd.f32 %v1149_v61, %v1051_v17 }
 0x1a5   : > { %v1272_v22 = vadd.f32 %v1259_v19, %v1162_v50 }
 0x1a7   : > { %v1382_v18 = vadd.f32 %v1369_v23, %v1272_v22 }
 0x1a8   : > { %v1041_v63 = vpop.f32.mrf.mxu1 }
 0x1a9   : > { %1390 = vst [vmem:[%s2453_s7 + $0x28] sm:$0xff] %v1382_v18  ;;  %v1052_v24 = vadd.f32 %v1041_v63, %v942_v52 }
 0x1ab   : > { %v1163_v28 = vadd.f32 %v1152_v9, %v1052_v24 }
 0x1ad   : > { %v1273_v30 = vadd.f32 %v1262_v54, %v1163_v28 }
 0x1af   : > { %v1383_v31 = vadd.f32 %v1372_v26, %v1273_v30 }
 0x1b0   : > { %v1043_v7 = vpop.f32.mrf.mxu1 }
 0x1b1   : > { %1391 = vst [vmem:[%s2453_s7 + $0x30] sm:$0xff] %v1383_v31  ;;  %v1053_v29 = vadd.f32 %v1043_v7, %v943_v57 }
 0x1b3   : > { %v1164_v33 = vadd.f32 %v1154_v20, %v1053_v29 }
 0x1b5   : > { %v1274_v60 = vadd.f32 %v1264_v34, %v1164_v33 }
 0x1b7   : > { %v1384_v35 = vadd.f32 %v1374_v27, %v1274_v60 }
 0x1b9   : > { %1392 = vst [vmem:[%s2453_s7 + $0x38] sm:$0xff] %v1384_v35 }
 0x1ba PF: > { %s14_s17 = sadd.s32 1, %s2005_s17   ;;  %s2494_s15 = smov %s2001_s16 }
 0x1bb   : > { %p11_p5 = scmp.ge.s32.totalorder %s14_s17, 4   ;;  %s2495_s16 = smov %s2497_s18 }
 0x1bd   :  { %13 = sbr.rel (!%p11_p5) target bundleno = 2 (0x2), region = 86 }

</bundles_post_ra>
